<compile_context>
chip_gen: v7x
topology: tpu7x:2x2x1
jax: 0.10.0
libtpu: 0.0.40
codegen_flags: <defaults>
</compile_context>

<pallas_src>
import functools
import math

import jax
import jax.numpy as jnp
from jax import lax
from jax.experimental import pallas as pl
from jax.experimental.pallas import tpu as pltpu


def _pa_kernel(x_ref, w_ref, b_ref, o_ref, *, nb):
    """Pixel-attention forward for a block of `nb` samples.

    x_ref, o_ref : (nb, C, HW)  -- channels in sublanes, pixels in lanes
    w_ref        : (C, C)       -- 1x1 conv weight (C_out, C_in)
    b_ref        : (C, 1)       -- conv bias (broadcast over pixels)
    """
    w = w_ref[...]
    b = b_ref[...]

    def body(n, carry):
        xn = x_ref[n]                                            # (C, HW)
        y = jnp.dot(w, xn, preferred_element_type=jnp.float32) + b
        o_ref[n] = xn * jax.nn.sigmoid(y)
        return carry

    lax.fori_loop(0, nb, body, 0, unroll=True)


def pa_forward(x, weight, bias, *, samples_per_block=8):
    """PA forward.

    x:      (..., C, H, W) float array (any number of leading dims, e.g.
            [B, C, H, W] or the spiking [T, B, C, H, W] layout).
    weight: (C, C, 1, 1) torch Conv2d weight layout (C_out, C_in, 1, 1).
    bias:   (C,) conv bias.
    """
    orig_shape = x.shape
    C, H, W = orig_shape[-3:]
    lead = orig_shape[:-3]
    N = int(math.prod(lead)) if lead else 1
    HW = H * W

    # layout: pure reshape to [N, C, H*W] -- pixels land in the lane dim.
    x2 = x.reshape(N, C, HW).astype(jnp.float32)
    w = weight.reshape(C, C).astype(jnp.float32)
    b = bias.reshape(C, 1).astype(jnp.float32)

    nb = max(1, min(samples_per_block, N))
    n_pad = (-N) % nb
    if n_pad:
        x2 = jnp.concatenate(
            [x2, jnp.zeros((n_pad, C, HW), jnp.float32)], axis=0)
    n_blocks = (N + n_pad) // nb

    kernel = functools.partial(_pa_kernel, nb=nb)
    out = pl.pallas_call(
        kernel,
        out_shape=jax.ShapeDtypeStruct((N + n_pad, C, HW), jnp.float32),
        grid=(n_blocks,),
        in_specs=[
            pl.BlockSpec((nb, C, HW), lambda i: (i, 0, 0)),  # x block
            pl.BlockSpec((C, C), lambda i: (0, 0)),          # weight (resident)
            pl.BlockSpec((C, 1), lambda i: (0, 0)),          # bias (resident)
        ],
        out_specs=pl.BlockSpec((nb, C, HW), lambda i: (i, 0, 0)),
        compiler_params=pltpu.CompilerParams(
            dimension_semantics=("parallel",)),
    )(x2, w, b)

    return out[:N].reshape(orig_shape)


if __name__ == "__main__":
    # Small shapes consistent with the module: nf = 4 channels, 16x16 spatial.
    B, C, H, W = 2, 4, 16, 16

    key = jax.random.PRNGKey(0)
    kx, kw, kb = jax.random.split(key, 3)
    x = jax.random.normal(kx, (B, C, H, W), dtype=jnp.float32)
    # torch Conv2d(nf, nf, 1): weight (C_out, C_in, 1, 1), bias (C_out,)
    weight = 0.5 * jax.random.normal(kw, (C, C, 1, 1), dtype=jnp.float32)
    bias = 0.1 * jax.random.normal(kb, (C,), dtype=jnp.float32)

    out = pa_forward(x, weight, bias)
    jax.block_until_ready(out)
    assert out.shape == (B, C, H, W)

    # Pure-JAX reference (1x1 conv + sigmoid gate) for a correctness check.
    y_ref = jnp.einsum("oc,bchw->bohw", weight.reshape(C, C), x) \
        + bias.reshape(1, C, 1, 1)
    ref = x * jax.nn.sigmoid(y_ref)
    assert jnp.allclose(out, ref, atol=1e-2, rtol=1e-3), \
        float(jnp.max(jnp.abs(out - ref)))

    print("KERNEL_OK")
</pallas_src>

<mosaic_0001>
module attributes {stable_mosaic.version = 11 : i64} {
  func.func @_pa_kernel(%arg0: i32, %arg1: memref<2x4x256xf32, #tpu.memory_space<vmem>>, %arg2: memref<4x4xf32, #tpu.memory_space<vmem>>, %arg3: memref<4x1xf32, #tpu.memory_space<vmem>>, %arg4: memref<2x4x256xf32, #tpu.memory_space<vmem>>) attributes {dimension_semantics = [#tpu.dimension_semantics<parallel>], iteration_bounds = array<i64: 1>, scalar_prefetch = 0 : i64, scratch_operands = 0 : i64, tpu.core_type = #tpu.core_type<tc>, window_params = [{transform_indices = @transform_0, window_bounds = array<i64: 2, 4, 256>}, {pipeline_mode = #tpu.pipeline_mode<synchronous>, transform_indices = @transform_1, window_bounds = array<i64: 4, 4>}, {pipeline_mode = #tpu.pipeline_mode<synchronous>, transform_indices = @transform_2, window_bounds = array<i64: 4, 1>}, {transform_indices = @transform_3, window_bounds = array<i64: 2, 4, 256>}]} {
    %c0 = arith.constant 0 : index
    %c0_0 = arith.constant 0 : index
    %0 = vector.load %arg2[%c0, %c0_0] : memref<4x4xf32, #tpu.memory_space<vmem>>, vector<4x4xf32>
    %c0_1 = arith.constant 0 : index
    %c0_2 = arith.constant 0 : index
    %1 = vector.load %arg3[%c0_1, %c0_2] : memref<4x1xf32, #tpu.memory_space<vmem>>, vector<4x1xf32>
    %c0_i32 = arith.constant 0 : i32
    %2 = arith.index_cast %c0_i32 : i32 to index
    %c0_3 = arith.constant 0 : index
    %c0_4 = arith.constant 0 : index
    %3 = vector.load %arg1[%2, %c0_3, %c0_4] : memref<2x4x256xf32, #tpu.memory_space<vmem>>, vector<1x4x256xf32>
    %4 = vector.shape_cast %3 : vector<1x4x256xf32> to vector<4x256xf32>
    %cst = arith.constant dense<0.000000e+00> : vector<4x256xf32>
    %5 = tpu.matmul %0, %4, %cst {dimension_numbers = #tpu.dot_dimension_numbers<[1], [0], [0], [1], [0, 0, 1, 1], [], []>} : vector<4x4xf32>, vector<4x256xf32>, vector<4x256xf32> -> vector<4x256xf32>
    %6 = vector.broadcast %1 : vector<4x1xf32> to vector<4x256xf32>
    %7 = arith.addf %5, %6 : vector<4x256xf32>
    %8 = arith.negf %7 : vector<4x256xf32>
    %9 = math.exp %8 : vector<4x256xf32>
    %cst_5 = arith.constant 1.000000e+00 : f32
    %10 = vector.broadcast %cst_5 : f32 to vector<4x256xf32>
    %11 = arith.addf %10, %9 : vector<4x256xf32>
    %12 = arith.divf %10, %11 : vector<4x256xf32>
    %13 = arith.mulf %4, %12 : vector<4x256xf32>
    %14 = arith.index_cast %c0_i32 : i32 to index
    %c0_6 = arith.constant 0 : index
    %c0_7 = arith.constant 0 : index
    %15 = vector.load %arg4[%14, %c0_6, %c0_7] : memref<2x4x256xf32, #tpu.memory_space<vmem>>, vector<1x4x256xf32>
    %16 = vector.shape_cast %15 : vector<1x4x256xf32> to vector<4x256xf32>
    %17 = vector.shape_cast %13 : vector<4x256xf32> to vector<1x4x256xf32>
    tpu.vector_store %arg4[%14, %c0_6, %c0_7], %17 {strides = array<i32>} : memref<2x4x256xf32, #tpu.memory_space<vmem>>, vector<1x4x256xf32>,
    %c1_i32 = arith.constant 1 : i32
    %18 = arith.index_cast %c1_i32 : i32 to index
    %c0_8 = arith.constant 0 : index
    %c0_9 = arith.constant 0 : index
    %19 = vector.load %arg1[%18, %c0_8, %c0_9] : memref<2x4x256xf32, #tpu.memory_space<vmem>>, vector<1x4x256xf32>
    %20 = vector.shape_cast %19 : vector<1x4x256xf32> to vector<4x256xf32>
    %cst_10 = arith.constant dense<0.000000e+00> : vector<4x256xf32>
    %21 = tpu.matmul %0, %20, %cst_10 {dimension_numbers = #tpu.dot_dimension_numbers<[1], [0], [0], [1], [0, 0, 1, 1], [], []>} : vector<4x4xf32>, vector<4x256xf32>, vector<4x256xf32> -> vector<4x256xf32>
    %22 = vector.broadcast %1 : vector<4x1xf32> to vector<4x256xf32>
    %23 = arith.addf %21, %22 : vector<4x256xf32>
    %24 = arith.negf %23 : vector<4x256xf32>
    %25 = math.exp %24 : vector<4x256xf32>
    %cst_11 = arith.constant 1.000000e+00 : f32
    %26 = vector.broadcast %cst_11 : f32 to vector<4x256xf32>
    %27 = arith.addf %26, %25 : vector<4x256xf32>
    %28 = arith.divf %26, %27 : vector<4x256xf32>
    %29 = arith.mulf %20, %28 : vector<4x256xf32>
    %30 = arith.index_cast %c1_i32 : i32 to index
    %c0_12 = arith.constant 0 : index
    %c0_13 = arith.constant 0 : index
    %31 = vector.load %arg4[%30, %c0_12, %c0_13] : memref<2x4x256xf32, #tpu.memory_space<vmem>>, vector<1x4x256xf32>
    %32 = vector.shape_cast %31 : vector<1x4x256xf32> to vector<4x256xf32>
    %33 = vector.shape_cast %29 : vector<4x256xf32> to vector<1x4x256xf32>
    tpu.vector_store %arg4[%30, %c0_12, %c0_13], %33 {strides = array<i32>} : memref<2x4x256xf32, #tpu.memory_space<vmem>>, vector<1x4x256xf32>,
    %c2_i32 = arith.constant 2 : i32
    return
  }
  func.func @transform_0(%arg0: i32) -> (i32, i32, i32) {
    %c0_i32 = arith.constant 0 : i32
    %c0_i32_0 = arith.constant 0 : i32
    %c0_i32_1 = arith.constant 0 : i32
    return %arg0, %c0_i32, %c0_i32_0 : i32, i32, i32
  }
  func.func @transform_1(%arg0: i32) -> (i32, i32) {
    %c0_i32 = arith.constant 0 : i32
    %c0_i32_0 = arith.constant 0 : i32
    %c0_i32_1 = arith.constant 0 : i32
    return %c0_i32, %c0_i32_0 : i32, i32
  }
  func.func @transform_2(%arg0: i32) -> (i32, i32) {
    %c0_i32 = arith.constant 0 : i32
    %c0_i32_0 = arith.constant 0 : i32
    %c0_i32_1 = arith.constant 0 : i32
    return %c0_i32, %c0_i32_0 : i32, i32
  }
  func.func @transform_3(%arg0: i32) -> (i32, i32, i32) {
    %c0_i32 = arith.constant 0 : i32
    %c0_i32_0 = arith.constant 0 : i32
    %c0_i32_1 = arith.constant 0 : i32
    return %arg0, %c0_i32, %c0_i32_0 : i32, i32, i32
  }
}

</mosaic_0001>

<bundles_post_ra>
// kernel: tpu_custom_call.1
= control target key start
LH: loop header
LB: loop body
LE: loop exit
PB: predicated region body
PF: predicated region fallthrough
CT: control target
= control target key end

     0   :  { %8 = vsyncpa [#allocation3], 0  ;;  %s397_s0 = inlined_call_operand.hbm [shape: f32[2,4,256], index: 0, kind: input, shape index: {}]   ;;  %s398_s1 = inlined_call_operand.vmem [shape: f32[4,4], index: 1, kind: input, shape index: {}]   ;;  %s399_s2 = inlined_call_operand.vmem [shape: f32[4,1], index: 2, kind: input, shape index: {}]   ;;  %s400_s3 = inlined_call_operand.hbm [shape: f32[2,4,256], index: 3, kind: output, shape index: {}]  }
   0x1   :  { %9 = vsyncpa [#allocation4], 0  ;;  %s335_s12 = smov [#allocation2]   ;;  %s287_s16 = scalar_lea.hbm %s397_s0, 256 }
   0x2   :  { %s15_s13 = sshll.u32 %s335_s12, 4  ;;  %p288_p0 = scmp.ne.s32.totalorder %s397_s0, %s287_s16  ;;  %s16_s13 = int_to_ptr.vmem [resolvable:$true] %s15_s13 }
   0x3   :  { %p291_p1 = scmp.lt.u32.totalorder %s287_s16, %s397_s0 }
   0x5   :  { %p293_p2 = pnand %p291_p1, %p288_p0 }
   0x7   :  { %296 = shalt.err (!%p293_p2)
}
   0x8   :  { %s297_s21 = scalar_lea.vmem %s16_s13, 256  ;;  %p302_p4 = scmp.lt.s32.totalorder %s16_s13, %s16_s13 }
   0x9   :  { %p298_p3 = scmp.ne.s32.totalorder %s16_s13, %s297_s21  ;;  %p303_p5 = scmp.lt.s32.totalorder %s297_s21, %s297_s21 }
   0xb   :  { %p304_p6 = por %p303_p5, %p302_p4 }
   0xd   :  { %p305_p7 = pnand %p304_p6, %p298_p3 }
   0xf   :  { %308 = shalt.err (!%p305_p7)
}
  0x10   :  { %s336_s22 = smov 128   ;;  %s337_s23 = smov 8  }
  0x11   :  { %21 = dma.hbm_to_vmem [thread:$0]  %s397_s0, 256, %s16_s13, [#allocation3], %s336_s22, %s336_s22, %s337_s23  }
  0x12   :  { %331 = dma.done.wait [#allocation3], 256  }
  0x13   :  { %332 = vsyncadd [#allocation3], 4294967040  ;;  %v338_v0 = vmov 0.0   ;;  %v339_v1 = vmov 0   ;;  %v31_v2 = vld [vmem:[#allocation2] sm:$0xff]  ;;  %vm43_vm0 = vcmask 1043456  }
  0x14   :  { %112 = vmatprep.mubr.f32.mxu0 %v338_v0  ;;  %209 = vmatprep.mubr.f32.mxu1 %v338_v0  ;;  %v138_v3 = vld [vmem:[#allocation2 + $0x8] sm:$0xff]  ;;  %v38_v4 = vcombine.high %v31_v2, %v31_v2  ;;  %v30_v6 = vld [vmem:[%s399_s2] sm:$0xf]  ;;  %vm39_vm1 = vcmask 31744   ;;  %s340_s0 = smov [#allocation5]  }
  0x15   :  { %268 = vset.pattern.permute.xlu0 %v339_v1  ;;  %v140_v5 = vcombine.high %v138_v3, %v138_v3  ;;  %v29_v7 = vld [vmem:[%s398_s1] sm:$0xf]  ;;  %s240_s1 = sshll.u32 %s340_s0, 4  ;;  %s241_s1 = int_to_ptr.vmem [resolvable:$true] %s240_s1 }
  0x16   :  { %34 = vperm.xlu0 %268, %v30_v6   ;;  %252 = vmatprep.subr.msk.mxu0 %vm43_vm0, %v38_v4  ;;  %s309_s2 = scalar_lea.vmem %s241_s1, 256  ;;  %p314_p9 = scmp.lt.s32.totalorder %s241_s1, %s241_s1 }
  0x17   :  { %257 = vmatprep.subr.msk.mxu1 %vm43_vm0, %v140_v5  ;;  %253 = vmatpush1.msk.msra.mxu0 %vm43_vm0, %v31_v2  ;;  %p310_p8 = scmp.ne.s32.totalorder %s241_s1, %s309_s2  ;;  %p315_p10 = scmp.lt.s32.totalorder %s309_s2, %s309_s2 }
  0x18   :  { %258 = vmatpush1.msk.msra.mxu1 %vm43_vm0, %v138_v3  ;;  %254 = vmatmul.mubr.msk.f32.vlgmr.msra.gmra.mrb[0].mxu0 %vm39_vm1, %v29_v7 }
  0x19   :  { %259 = vmatmul.mubr.msk.f32.vlgmr.msra.gmra.mrb[0].mxu1 %vm39_vm1, %v29_v7  ;;  %p316_p11 = por %p315_p10, %p314_p9 }
  0x1b   :  { %p317_p12 = pnand %p316_p11, %p310_p8 }
  0x95   :  { %v35_v8 = vpop.permute.xlu0 %34 }
  0xeb   :  { %v114_v9 = vpop.f32.mrb[0].mxu0 }
  0xec   :  { %v211_v10 = vpop.f32.mrb[0].mxu1  ;;  %v115_v11 = vadd.f32 %v114_v9, %v35_v8  ;;  %v116_v13 = vpop.f32.mrb[1].mxu0 }
  0xed   :  { %v212_v12 = vadd.f32 %v211_v10, %v35_v8  ;;  %v213_v14 = vpop.f32.mrb[1].mxu1  ;;  %v117_v15 = vadd.f32 %v116_v13, %v35_v8 }
  0xee   :  { %v214_v16 = vadd.f32 %v213_v14, %v35_v8  ;;  %v255_v17 = vmul.f32 -1.442695, %v115_v11 }
  0xef   :  { %v260_v18 = vmul.f32 -1.442695, %v212_v12  ;;  %v256_v19 = vmul.f32 -1.442695, %v117_v15 }
  0xf0   :  { %v261_v20 = vmul.f32 -1.442695, %v214_v16  ;;  %271 = vpow2.f32 %v255_v17 }
  0xf1   :  { %273 = vpow2.f32 %v260_v18 }
  0xf2   :  { %275 = vpow2.f32 %v256_v19 }
  0xf3   :  { %277 = vpow2.f32 %v261_v20 }
  0xfa   :  { %v272_v21 = vpop.eup %271 }
  0xfb   :  { %v274_v22 = vpop.eup %273  ;;  %v125_v23 = vadd.f32 1.0, %v272_v21 }
  0xfc   :  { %v276_v24 = vpop.eup %275  ;;  %v222_v25 = vadd.f32 1.0, %v274_v22 }
  0xfd   :  { %v278_v26 = vpop.eup %277  ;;  %279 = vrcp.f32 %v125_v23  ;;  %v126_v27 = vadd.f32 1.0, %v276_v24 }
  0xfe   :  { %281 = vrcp.f32 %v222_v25  ;;  %v223_v28 = vadd.f32 1.0, %v278_v26 }
  0xff   :  { %283 = vrcp.f32 %v126_v27 }
 0x100   :  { %285 = vrcp.f32 %v223_v28 }
 0x107   :  { %v280_v29 = vpop.eup %279 }
 0x108   :  { %v282_v30 = vpop.eup %281 }
 0x109   :  { %v284_v31 = vpop.eup %283 }
 0x10a   :  { %v286_v32 = vpop.eup %285  ;;  %v133_v33 = vcombine.low %v280_v29, %v284_v31 }
 0x10b   :  { %v230_v34 = vcombine.low %v282_v30, %v286_v32 }
 0x10c   :  { %v135_v35 = vmul.f32 %v133_v33, %v31_v2 }
 0x10d   :  { %v232_v36 = vmul.f32 %v230_v34, %v138_v3 }
 0x10e   :  { %136 = vst [vmem:[#allocation5] sm:$0xff] %v135_v35 }
 0x10f   :  { %234 = vst [vmem:[#allocation5 + $0x8] sm:$0xff] %v232_v36 }
 0x110   :  { %320 = shalt.err (!%p317_p12)
}
 0x111   :  { %s321_s5 = scalar_lea.hbm %s400_s3, 256 }
 0x112   :  { %p322_p13 = scmp.ne.s32.totalorder %s400_s3, %s321_s5  ;;  %p325_p0 = scmp.lt.u32.totalorder %s321_s5, %s400_s3 }
 0x114   :  { %p327_p1 = pnand %p325_p0, %p322_p13 }
 0x116   :  { %330 = shalt.err (!%p327_p1)
}
 0x117   :  { %246 = dma.vmem_to_hbm [thread:$0]  %s241_s1, 256, %s400_s3, [#allocation4], %s336_s22, %s336_s22, %s337_s23  }
 0x118   :  { %333 = dma.done.wait [#allocation4], 256  }
 0x119   :  { %334 = vsyncadd [#allocation4], 4294967040 }
 0x11a   :  { %250 = vsyncpa [#allocation3], 1 }
 0x11b   :  { %251 = vsyncpa [#allocation4], 1 }

</bundles_post_ra>
